<compile_context>
chip_gen: v5e
topology: v5e:2x2
jax: 0.10.0
libtpu: 0.0.40
codegen_flags: <defaults>
</compile_context>

<pallas_src>
import functools
import math

import jax
import jax.numpy as jnp
from jax import lax
from jax.experimental import pallas as pl
from jax.experimental.pallas import tpu as pltpu


def _mha_kernel(q_ref, k_ref, v_ref,
                wq_ref, bq_ref, wk_ref, bk_ref, wv_ref, bv_ref,
                wo_ref, bo_ref, out_ref, *, num_heads, d_k):
    """Fused multi-head attention for one batch element.

    q_ref        : VMEM (Sq, D)
    k_ref, v_ref : VMEM (Sk, D)
    w*_ref       : VMEM (D, D)   projection weights, stored (in, out)
    b*_ref       : VMEM (1, D)   biases
    out_ref      : VMEM (Sq, D)
    """
    q = q_ref[...]
    k = k_ref[...]
    v = v_ref[...]

    q_proj = jnp.dot(q, wq_ref[...], preferred_element_type=jnp.float32) + bq_ref[...]
    k_proj = jnp.dot(k, wk_ref[...], preferred_element_type=jnp.float32) + bk_ref[...]
    v_proj = jnp.dot(v, wv_ref[...], preferred_element_type=jnp.float32) + bv_ref[...]

    scale = 1.0 / math.sqrt(float(d_k))
    head_outs = []
    for h in range(num_heads):          # static unroll: one (S, d_k) slab per head
        lo = h * d_k
        qh = q_proj[:, lo:lo + d_k]     # (Sq, d_k)
        kh = k_proj[:, lo:lo + d_k]     # (Sk, d_k)
        vh = v_proj[:, lo:lo + d_k]     # (Sk, d_k)
        # scores = qh @ kh^T / sqrt(d_k)  (contract over d_k, no explicit transpose)
        s = lax.dot_general(qh, kh, (((1,), (1,)), ((), ())),
                            preferred_element_type=jnp.float32) * scale
        # TODO(synk): optional attention mask path (masked_fill(mask==0, -1e4))
        #             not implemented; module default mask=None is what we match.
        m = jnp.max(s, axis=-1, keepdims=True)
        e = jnp.exp(s - m)
        p = e / jnp.sum(e, axis=-1, keepdims=True)
        head_outs.append(jnp.dot(p, vh, preferred_element_type=jnp.float32))

    concat = jnp.concatenate(head_outs, axis=-1)        # (Sq, D), head-major
    out = jnp.dot(concat, wo_ref[...], preferred_element_type=jnp.float32) + bo_ref[...]
    out_ref[...] = out.astype(out_ref.dtype)


def multi_head_attention(q, k, v, params, *, num_heads):
    """q: (B, Sq, D), k/v: (B, Sk, D) -> (B, Sq, D)."""
    B, Sq, D = q.shape
    Sk = k.shape[1]
    assert D % num_heads == 0, "num heads must divide d_model"
    d_k = D // num_heads
    wq, bq, wk, bk, wv, bv, wo, bo = params

    kernel = functools.partial(_mha_kernel, num_heads=num_heads, d_k=d_k)
    const = lambda b: (0, 0)   # weights/biases: same block every grid step

    return pl.pallas_call(
        kernel,
        out_shape=jax.ShapeDtypeStruct((B, Sq, D), q.dtype),
        grid=(B,),
        in_specs=[
            pl.BlockSpec((None, Sq, D), lambda b: (b, 0, 0)),   # q  (batch squeezed)
            pl.BlockSpec((None, Sk, D), lambda b: (b, 0, 0)),   # k
            pl.BlockSpec((None, Sk, D), lambda b: (b, 0, 0)),   # v
            pl.BlockSpec((D, D), const), pl.BlockSpec((1, D), const),   # Wq, bq
            pl.BlockSpec((D, D), const), pl.BlockSpec((1, D), const),   # Wk, bk
            pl.BlockSpec((D, D), const), pl.BlockSpec((1, D), const),   # Wv, bv
            pl.BlockSpec((D, D), const), pl.BlockSpec((1, D), const),   # Wo, bo
        ],
        out_specs=pl.BlockSpec((None, Sq, D), lambda b: (b, 0, 0)),
        compiler_params=pltpu.CompilerParams(
            dimension_semantics=("parallel",),   # batch steps are independent
        ),
    )(q, k, v, wq, bq, wk, bk, wv, bv, wo, bo)


if __name__ == "__main__":
    # Small shapes consistent with the module.
    d_model, num_heads = 32, 4
    batch, seq = 2, 8

    key = jax.random.PRNGKey(0)
    keys = jax.random.split(key, 11)

    def lin_init(kw, kb, fan_in, fan_out):
        # nn.Linear default init: U(-1/sqrt(fan_in), 1/sqrt(fan_in)); weight stored (in, out).
        bound = 1.0 / math.sqrt(fan_in)
        w = jax.random.uniform(kw, (fan_in, fan_out), jnp.float32, -bound, bound)
        b = jax.random.uniform(kb, (1, fan_out), jnp.float32, -bound, bound)
        return w, b

    wq, bq = lin_init(keys[0], keys[1], d_model, d_model)
    wk, bk = lin_init(keys[2], keys[3], d_model, d_model)
    wv, bv = lin_init(keys[4], keys[5], d_model, d_model)
    wo, bo = lin_init(keys[6], keys[7], d_model, d_model)

    q = jax.random.normal(keys[8], (batch, seq, d_model), jnp.float32)
    k = jax.random.normal(keys[9], (batch, seq, d_model), jnp.float32)
    v = jax.random.normal(keys[10], (batch, seq, d_model), jnp.float32)

    params = (wq, bq, wk, bk, wv, bv, wo, bo)
    out = multi_head_attention(q, k, v, params, num_heads=num_heads)
    out = jax.block_until_ready(out)

    # Pure-JAX reference (same math as the PyTorch module, mask=None path).
    def ref_mha(q, k, v):
        B, Sq, D = q.shape
        Sk = k.shape[1]
        dk = D // num_heads
        qp = (q @ wq + bq).reshape(B, Sq, num_heads, dk).transpose(0, 2, 1, 3)
        kp = (k @ wk + bk).reshape(B, Sk, num_heads, dk).transpose(0, 2, 1, 3)
        vp = (v @ wv + bv).reshape(B, Sk, num_heads, dk).transpose(0, 2, 1, 3)
        s = jnp.einsum("bhqd,bhkd->bhqk", qp, kp) / math.sqrt(dk)
        p = jax.nn.softmax(s, axis=-1)
        o = jnp.einsum("bhqk,bhkd->bhqd", p, vp)
        o = o.transpose(0, 2, 1, 3).reshape(B, Sq, D)
        return o @ wo + bo

    ref = ref_mha(q, k, v)
    assert out.shape == (batch, seq, d_model)
    err = float(jnp.max(jnp.abs(out - ref)))
    assert jnp.allclose(out, ref, atol=1e-3, rtol=1e-3), f"max abs err {err}"

    print("KERNEL_OK")
</pallas_src>

<mosaic_0001>
module attributes {stable_mosaic.version = 11 : i64} {
  func.func @_mha_kernel(%arg0: i32, %arg1: memref<1x8x32xf32, #tpu.memory_space<vmem>>, %arg2: memref<1x8x32xf32, #tpu.memory_space<vmem>>, %arg3: memref<1x8x32xf32, #tpu.memory_space<vmem>>, %arg4: memref<32x32xf32, #tpu.memory_space<vmem>>, %arg5: memref<1x32xf32, #tpu.memory_space<vmem>>, %arg6: memref<32x32xf32, #tpu.memory_space<vmem>>, %arg7: memref<1x32xf32, #tpu.memory_space<vmem>>, %arg8: memref<32x32xf32, #tpu.memory_space<vmem>>, %arg9: memref<1x32xf32, #tpu.memory_space<vmem>>, %arg10: memref<32x32xf32, #tpu.memory_space<vmem>>, %arg11: memref<1x32xf32, #tpu.memory_space<vmem>>, %arg12: memref<1x8x32xf32, #tpu.memory_space<vmem>>) attributes {dimension_semantics = [#tpu.dimension_semantics<parallel>], iteration_bounds = array<i64: 2>, scalar_prefetch = 0 : i64, scratch_operands = 0 : i64, tpu.core_type = #tpu.core_type<tc>, window_params = [{transform_indices = @transform_0, window_bounds = array<i64: 1, 8, 32>}, {transform_indices = @transform_1, window_bounds = array<i64: 1, 8, 32>}, {transform_indices = @transform_2, window_bounds = array<i64: 1, 8, 32>}, {pipeline_mode = #tpu.pipeline_mode<synchronous>, transform_indices = @transform_3, window_bounds = array<i64: 32, 32>}, {pipeline_mode = #tpu.pipeline_mode<synchronous>, transform_indices = @transform_4, window_bounds = array<i64: 1, 32>}, {pipeline_mode = #tpu.pipeline_mode<synchronous>, transform_indices = @transform_5, window_bounds = array<i64: 32, 32>}, {pipeline_mode = #tpu.pipeline_mode<synchronous>, transform_indices = @transform_6, window_bounds = array<i64: 1, 32>}, {pipeline_mode = #tpu.pipeline_mode<synchronous>, transform_indices = @transform_7, window_bounds = array<i64: 32, 32>}, {pipeline_mode = #tpu.pipeline_mode<synchronous>, transform_indices = @transform_8, window_bounds = array<i64: 1, 32>}, {pipeline_mode = #tpu.pipeline_mode<synchronous>, transform_indices = @transform_9, window_bounds = array<i64: 32, 32>}, {pipeline_mode = #tpu.pipeline_mode<synchronous>, transform_indices = @transform_10, window_bounds = array<i64: 1, 32>}, {transform_indices = @transform_11, window_bounds = array<i64: 1, 8, 32>}]} {
    %c0 = arith.constant 0 : index
    %c0_0 = arith.constant 0 : index
    %c0_1 = arith.constant 0 : index
    %0 = vector.load %arg1[%c0, %c0_0, %c0_1] : memref<1x8x32xf32, #tpu.memory_space<vmem>>, vector<1x8x32xf32>
    %1 = vector.shape_cast %0 : vector<1x8x32xf32> to vector<8x32xf32>
    %c0_2 = arith.constant 0 : index
    %c0_3 = arith.constant 0 : index
    %c0_4 = arith.constant 0 : index
    %2 = vector.load %arg2[%c0_2, %c0_3, %c0_4] : memref<1x8x32xf32, #tpu.memory_space<vmem>>, vector<1x8x32xf32>
    %3 = vector.shape_cast %2 : vector<1x8x32xf32> to vector<8x32xf32>
    %c0_5 = arith.constant 0 : index
    %c0_6 = arith.constant 0 : index
    %c0_7 = arith.constant 0 : index
    %4 = vector.load %arg3[%c0_5, %c0_6, %c0_7] : memref<1x8x32xf32, #tpu.memory_space<vmem>>, vector<1x8x32xf32>
    %5 = vector.shape_cast %4 : vector<1x8x32xf32> to vector<8x32xf32>
    %c0_8 = arith.constant 0 : index
    %c0_9 = arith.constant 0 : index
    %6 = vector.load %arg4[%c0_8, %c0_9] : memref<32x32xf32, #tpu.memory_space<vmem>>, vector<32x32xf32>
    %cst = arith.constant dense<0.000000e+00> : vector<8x32xf32>
    %7 = tpu.matmul %1, %6, %cst {dimension_numbers = #tpu.dot_dimension_numbers<[1], [0], [0], [1], [0, 0, 1, 1], [], []>} : vector<8x32xf32>, vector<32x32xf32>, vector<8x32xf32> -> vector<8x32xf32>
    %c0_10 = arith.constant 0 : index
    %c0_11 = arith.constant 0 : index
    %8 = vector.load %arg5[%c0_10, %c0_11] : memref<1x32xf32, #tpu.memory_space<vmem>>, vector<1x32xf32>
    %9 = vector.broadcast %8 : vector<1x32xf32> to vector<8x32xf32>
    %10 = arith.addf %7, %9 : vector<8x32xf32>
    %c0_12 = arith.constant 0 : index
    %c0_13 = arith.constant 0 : index
    %11 = vector.load %arg6[%c0_12, %c0_13] : memref<32x32xf32, #tpu.memory_space<vmem>>, vector<32x32xf32>
    %cst_14 = arith.constant dense<0.000000e+00> : vector<8x32xf32>
    %12 = tpu.matmul %3, %11, %cst_14 {dimension_numbers = #tpu.dot_dimension_numbers<[1], [0], [0], [1], [0, 0, 1, 1], [], []>} : vector<8x32xf32>, vector<32x32xf32>, vector<8x32xf32> -> vector<8x32xf32>
    %c0_15 = arith.constant 0 : index
    %c0_16 = arith.constant 0 : index
    %13 = vector.load %arg7[%c0_15, %c0_16] : memref<1x32xf32, #tpu.memory_space<vmem>>, vector<1x32xf32>
    %14 = vector.broadcast %13 : vector<1x32xf32> to vector<8x32xf32>
    %15 = arith.addf %12, %14 : vector<8x32xf32>
    %c0_17 = arith.constant 0 : index
    %c0_18 = arith.constant 0 : index
    %16 = vector.load %arg8[%c0_17, %c0_18] : memref<32x32xf32, #tpu.memory_space<vmem>>, vector<32x32xf32>
    %cst_19 = arith.constant dense<0.000000e+00> : vector<8x32xf32>
    %17 = tpu.matmul %5, %16, %cst_19 {dimension_numbers = #tpu.dot_dimension_numbers<[1], [0], [0], [1], [0, 0, 1, 1], [], []>} : vector<8x32xf32>, vector<32x32xf32>, vector<8x32xf32> -> vector<8x32xf32>
    %c0_20 = arith.constant 0 : index
    %c0_21 = arith.constant 0 : index
    %18 = vector.load %arg9[%c0_20, %c0_21] : memref<1x32xf32, #tpu.memory_space<vmem>>, vector<1x32xf32>
    %19 = vector.broadcast %18 : vector<1x32xf32> to vector<8x32xf32>
    %20 = arith.addf %17, %19 : vector<8x32xf32>
    %21 = vector.extract_strided_slice %10 {offsets = [0, 0], sizes = [8, 8], strides = [1, 1]} : vector<8x32xf32> to vector<8x8xf32>
    %22 = vector.extract_strided_slice %15 {offsets = [0, 0], sizes = [8, 8], strides = [1, 1]} : vector<8x32xf32> to vector<8x8xf32>
    %23 = vector.extract_strided_slice %20 {offsets = [0, 0], sizes = [8, 8], strides = [1, 1]} : vector<8x32xf32> to vector<8x8xf32>
    %cst_22 = arith.constant dense<0.000000e+00> : vector<8x8xf32>
    %24 = tpu.matmul %21, %22, %cst_22 {dimension_numbers = #tpu.dot_dimension_numbers<[1], [1], [0], [0], [0, 0, 1, 0], [], []>} : vector<8x8xf32>, vector<8x8xf32>, vector<8x8xf32> -> vector<8x8xf32>
    %cst_23 = arith.constant 0.353553385 : f32
    %25 = vector.broadcast %cst_23 : f32 to vector<8x8xf32>
    %26 = arith.mulf %24, %25 : vector<8x8xf32>
    %cst_24 = arith.constant dense<0xFF800000> : vector<8xf32>
    %27 = vector.multi_reduction <maximumf>, %26, %cst_24 [1] : vector<8x8xf32> to vector<8xf32>
    %28 = vector.shape_cast %27 : vector<8xf32> to vector<8x1xf32>
    %29 = vector.broadcast %28 : vector<8x1xf32> to vector<8x8xf32>
    %30 = arith.subf %26, %29 : vector<8x8xf32>
    %31 = math.exp %30 : vector<8x8xf32>
    %cst_25 = arith.constant dense<0.000000e+00> : vector<8xf32>
    %32 = vector.multi_reduction <add>, %31, %cst_25 [1] : vector<8x8xf32> to vector<8xf32>
    %33 = vector.shape_cast %32 : vector<8xf32> to vector<8x1xf32>
    %34 = vector.broadcast %33 : vector<8x1xf32> to vector<8x8xf32>
    %35 = arith.divf %31, %34 : vector<8x8xf32>
    %cst_26 = arith.constant dense<0.000000e+00> : vector<8x8xf32>
    %36 = tpu.matmul %35, %23, %cst_26 {dimension_numbers = #tpu.dot_dimension_numbers<[1], [0], [0], [1], [0, 0, 1, 1], [], []>} : vector<8x8xf32>, vector<8x8xf32>, vector<8x8xf32> -> vector<8x8xf32>
    %37 = vector.extract_strided_slice %10 {offsets = [0, 8], sizes = [8, 8], strides = [1, 1]} : vector<8x32xf32> to vector<8x8xf32>
    %38 = vector.extract_strided_slice %15 {offsets = [0, 8], sizes = [8, 8], strides = [1, 1]} : vector<8x32xf32> to vector<8x8xf32>
    %39 = vector.extract_strided_slice %20 {offsets = [0, 8], sizes = [8, 8], strides = [1, 1]} : vector<8x32xf32> to vector<8x8xf32>
    %cst_27 = arith.constant dense<0.000000e+00> : vector<8x8xf32>
    %40 = tpu.matmul %37, %38, %cst_27 {dimension_numbers = #tpu.dot_dimension_numbers<[1], [1], [0], [0], [0, 0, 1, 0], [], []>} : vector<8x8xf32>, vector<8x8xf32>, vector<8x8xf32> -> vector<8x8xf32>
    %cst_28 = arith.constant 0.353553385 : f32
    %41 = vector.broadcast %cst_28 : f32 to vector<8x8xf32>
    %42 = arith.mulf %40, %41 : vector<8x8xf32>
    %cst_29 = arith.constant dense<0xFF800000> : vector<8xf32>
    %43 = vector.multi_reduction <maximumf>, %42, %cst_29 [1] : vector<8x8xf32> to vector<8xf32>
    %44 = vector.shape_cast %43 : vector<8xf32> to vector<8x1xf32>
    %45 = vector.broadcast %44 : vector<8x1xf32> to vector<8x8xf32>
    %46 = arith.subf %42, %45 : vector<8x8xf32>
    %47 = math.exp %46 : vector<8x8xf32>
    %cst_30 = arith.constant dense<0.000000e+00> : vector<8xf32>
    %48 = vector.multi_reduction <add>, %47, %cst_30 [1] : vector<8x8xf32> to vector<8xf32>
    %49 = vector.shape_cast %48 : vector<8xf32> to vector<8x1xf32>
    %50 = vector.broadcast %49 : vector<8x1xf32> to vector<8x8xf32>
    %51 = arith.divf %47, %50 : vector<8x8xf32>
    %cst_31 = arith.constant dense<0.000000e+00> : vector<8x8xf32>
    %52 = tpu.matmul %51, %39, %cst_31 {dimension_numbers = #tpu.dot_dimension_numbers<[1], [0], [0], [1], [0, 0, 1, 1], [], []>} : vector<8x8xf32>, vector<8x8xf32>, vector<8x8xf32> -> vector<8x8xf32>
    %53 = vector.extract_strided_slice %10 {offsets = [0, 16], sizes = [8, 8], strides = [1, 1]} : vector<8x32xf32> to vector<8x8xf32>
    %54 = vector.extract_strided_slice %15 {offsets = [0, 16], sizes = [8, 8], strides = [1, 1]} : vector<8x32xf32> to vector<8x8xf32>
    %55 = vector.extract_strided_slice %20 {offsets = [0, 16], sizes = [8, 8], strides = [1, 1]} : vector<8x32xf32> to vector<8x8xf32>
    %cst_32 = arith.constant dense<0.000000e+00> : vector<8x8xf32>
    %56 = tpu.matmul %53, %54, %cst_32 {dimension_numbers = #tpu.dot_dimension_numbers<[1], [1], [0], [0], [0, 0, 1, 0], [], []>} : vector<8x8xf32>, vector<8x8xf32>, vector<8x8xf32> -> vector<8x8xf32>
    %cst_33 = arith.constant 0.353553385 : f32
    %57 = vector.broadcast %cst_33 : f32 to vector<8x8xf32>
    %58 = arith.mulf %56, %57 : vector<8x8xf32>
    %cst_34 = arith.constant dense<0xFF800000> : vector<8xf32>
    %59 = vector.multi_reduction <maximumf>, %58, %cst_34 [1] : vector<8x8xf32> to vector<8xf32>
    %60 = vector.shape_cast %59 : vector<8xf32> to vector<8x1xf32>
    %61 = vector.broadcast %60 : vector<8x1xf32> to vector<8x8xf32>
    %62 = arith.subf %58, %61 : vector<8x8xf32>
    %63 = math.exp %62 : vector<8x8xf32>
    %cst_35 = arith.constant dense<0.000000e+00> : vector<8xf32>
    %64 = vector.multi_reduction <add>, %63, %cst_35 [1] : vector<8x8xf32> to vector<8xf32>
    %65 = vector.shape_cast %64 : vector<8xf32> to vector<8x1xf32>
    %66 = vector.broadcast %65 : vector<8x1xf32> to vector<8x8xf32>
    %67 = arith.divf %63, %66 : vector<8x8xf32>
    %cst_36 = arith.constant dense<0.000000e+00> : vector<8x8xf32>
    %68 = tpu.matmul %67, %55, %cst_36 {dimension_numbers = #tpu.dot_dimension_numbers<[1], [0], [0], [1], [0, 0, 1, 1], [], []>} : vector<8x8xf32>, vector<8x8xf32>, vector<8x8xf32> -> vector<8x8xf32>
    %69 = vector.extract_strided_slice %10 {offsets = [0, 24], sizes = [8, 8], strides = [1, 1]} : vector<8x32xf32> to vector<8x8xf32>
    %70 = vector.extract_strided_slice %15 {offsets = [0, 24], sizes = [8, 8], strides = [1, 1]} : vector<8x32xf32> to vector<8x8xf32>
    %71 = vector.extract_strided_slice %20 {offsets = [0, 24], sizes = [8, 8], strides = [1, 1]} : vector<8x32xf32> to vector<8x8xf32>
    %cst_37 = arith.constant dense<0.000000e+00> : vector<8x8xf32>
    %72 = tpu.matmul %69, %70, %cst_37 {dimension_numbers = #tpu.dot_dimension_numbers<[1], [1], [0], [0], [0, 0, 1, 0], [], []>} : vector<8x8xf32>, vector<8x8xf32>, vector<8x8xf32> -> vector<8x8xf32>
    %cst_38 = arith.constant 0.353553385 : f32
    %73 = vector.broadcast %cst_38 : f32 to vector<8x8xf32>
    %74 = arith.mulf %72, %73 : vector<8x8xf32>
    %cst_39 = arith.constant dense<0xFF800000> : vector<8xf32>
    %75 = vector.multi_reduction <maximumf>, %74, %cst_39 [1] : vector<8x8xf32> to vector<8xf32>
    %76 = vector.shape_cast %75 : vector<8xf32> to vector<8x1xf32>
    %77 = vector.broadcast %76 : vector<8x1xf32> to vector<8x8xf32>
    %78 = arith.subf %74, %77 : vector<8x8xf32>
    %79 = math.exp %78 : vector<8x8xf32>
    %cst_40 = arith.constant dense<0.000000e+00> : vector<8xf32>
    %80 = vector.multi_reduction <add>, %79, %cst_40 [1] : vector<8x8xf32> to vector<8xf32>
    %81 = vector.shape_cast %80 : vector<8xf32> to vector<8x1xf32>
    %82 = vector.broadcast %81 : vector<8x1xf32> to vector<8x8xf32>
    %83 = arith.divf %79, %82 : vector<8x8xf32>
    %cst_41 = arith.constant dense<0.000000e+00> : vector<8x8xf32>
    %84 = tpu.matmul %83, %71, %cst_41 {dimension_numbers = #tpu.dot_dimension_numbers<[1], [0], [0], [1], [0, 0, 1, 1], [], []>} : vector<8x8xf32>, vector<8x8xf32>, vector<8x8xf32> -> vector<8x8xf32>
    %85 = tpu.concatenate %36, %52, %68, %84 in 1 : vector<8x8xf32>, vector<8x8xf32>, vector<8x8xf32>, vector<8x8xf32> -> vector<8x32xf32>
    %c0_42 = arith.constant 0 : index
    %c0_43 = arith.constant 0 : index
    %86 = vector.load %arg10[%c0_42, %c0_43] : memref<32x32xf32, #tpu.memory_space<vmem>>, vector<32x32xf32>
    %cst_44 = arith.constant dense<0.000000e+00> : vector<8x32xf32>
    %87 = tpu.matmul %85, %86, %cst_44 {dimension_numbers = #tpu.dot_dimension_numbers<[1], [0], [0], [1], [0, 0, 1, 1], [], []>} : vector<8x32xf32>, vector<32x32xf32>, vector<8x32xf32> -> vector<8x32xf32>
    %c0_45 = arith.constant 0 : index
    %c0_46 = arith.constant 0 : index
    %88 = vector.load %arg11[%c0_45, %c0_46] : memref<1x32xf32, #tpu.memory_space<vmem>>, vector<1x32xf32>
    %89 = vector.broadcast %88 : vector<1x32xf32> to vector<8x32xf32>
    %90 = arith.addf %87, %89 : vector<8x32xf32>
    %c0_47 = arith.constant 0 : index
    %c0_48 = arith.constant 0 : index
    %c0_49 = arith.constant 0 : index
    %91 = vector.load %arg12[%c0_47, %c0_48, %c0_49] : memref<1x8x32xf32, #tpu.memory_space<vmem>>, vector<1x8x32xf32>
    %92 = vector.shape_cast %91 : vector<1x8x32xf32> to vector<8x32xf32>
    %93 = vector.shape_cast %90 : vector<8x32xf32> to vector<1x8x32xf32>
    tpu.vector_store %arg12[%c0_47, %c0_48, %c0_49], %93 {strides = array<i32>} : memref<1x8x32xf32, #tpu.memory_space<vmem>>, vector<1x8x32xf32>,
    return
  }
  func.func @transform_0(%arg0: i32) -> (i32, i32, i32) {
    %c0_i32 = arith.constant 0 : i32
    %c0_i32_0 = arith.constant 0 : i32
    %c0_i32_1 = arith.constant 0 : i32
    return %arg0, %c0_i32, %c0_i32_0 : i32, i32, i32
  }
  func.func @transform_1(%arg0: i32) -> (i32, i32, i32) {
    %c0_i32 = arith.constant 0 : i32
    %c0_i32_0 = arith.constant 0 : i32
    %c0_i32_1 = arith.constant 0 : i32
    return %arg0, %c0_i32, %c0_i32_0 : i32, i32, i32
  }
  func.func @transform_2(%arg0: i32) -> (i32, i32, i32) {
    %c0_i32 = arith.constant 0 : i32
    %c0_i32_0 = arith.constant 0 : i32
    %c0_i32_1 = arith.constant 0 : i32
    return %arg0, %c0_i32, %c0_i32_0 : i32, i32, i32
  }
  func.func @transform_3(%arg0: i32) -> (i32, i32) {
    %c0_i32 = arith.constant 0 : i32
    %c0_i32_0 = arith.constant 0 : i32
    %c0_i32_1 = arith.constant 0 : i32
    return %c0_i32, %c0_i32_0 : i32, i32
  }
  func.func @transform_4(%arg0: i32) -> (i32, i32) {
    %c0_i32 = arith.constant 0 : i32
    %c0_i32_0 = arith.constant 0 : i32
    %c0_i32_1 = arith.constant 0 : i32
    return %c0_i32, %c0_i32_0 : i32, i32
  }
  func.func @transform_5(%arg0: i32) -> (i32, i32) {
    %c0_i32 = arith.constant 0 : i32
    %c0_i32_0 = arith.constant 0 : i32
    %c0_i32_1 = arith.constant 0 : i32
    return %c0_i32, %c0_i32_0 : i32, i32
  }
  func.func @transform_6(%arg0: i32) -> (i32, i32) {
    %c0_i32 = arith.constant 0 : i32
    %c0_i32_0 = arith.constant 0 : i32
    %c0_i32_1 = arith.constant 0 : i32
    return %c0_i32, %c0_i32_0 : i32, i32
  }
  func.func @transform_7(%arg0: i32) -> (i32, i32) {
    %c0_i32 = arith.constant 0 : i32
    %c0_i32_0 = arith.constant 0 : i32
    %c0_i32_1 = arith.constant 0 : i32
    return %c0_i32, %c0_i32_0 : i32, i32
  }
  func.func @transform_8(%arg0: i32) -> (i32, i32) {
    %c0_i32 = arith.constant 0 : i32
    %c0_i32_0 = arith.constant 0 : i32
    %c0_i32_1 = arith.constant 0 : i32
    return %c0_i32, %c0_i32_0 : i32, i32
  }
  func.func @transform_9(%arg0: i32) -> (i32, i32) {
    %c0_i32 = arith.constant 0 : i32
    %c0_i32_0 = arith.constant 0 : i32
    %c0_i32_1 = arith.constant 0 : i32
    return %c0_i32, %c0_i32_0 : i32, i32
  }
  func.func @transform_10(%arg0: i32) -> (i32, i32) {
    %c0_i32 = arith.constant 0 : i32
    %c0_i32_0 = arith.constant 0 : i32
    %c0_i32_1 = arith.constant 0 : i32
    return %c0_i32, %c0_i32_0 : i32, i32
  }
  func.func @transform_11(%arg0: i32) -> (i32, i32, i32) {
    %c0_i32 = arith.constant 0 : i32
    %c0_i32_0 = arith.constant 0 : i32
    %c0_i32_1 = arith.constant 0 : i32
    return %arg0, %c0_i32, %c0_i32_0 : i32, i32, i32
  }
}

</mosaic_0001>

<bundles_post_ra>
// kernel: tpu_custom_call.1
= control target key start
LH: loop header
LB: loop body
LE: loop exit
PB: predicated region body
PF: predicated region fallthrough
CT: control target
= control target key end

     0   :  { %s1995_s0 = inlined_call_operand.hbm [shape: f32[2,8,32], index: 0, kind: input, shape index: {}]   ;;  %s1996_s1 = inlined_call_operand.hbm [shape: f32[2,8,32], index: 1, kind: input, shape index: {}]   ;;  %s1997_s2 = inlined_call_operand.hbm [shape: f32[2,8,32], index: 2, kind: input, shape index: {}]   ;;  %s1998_s3 = inlined_call_operand.hbm [shape: f32[32,32], index: 3, kind: input, shape index: {}]   ;;  %s1999_s4 = inlined_call_operand.vmem [shape: f32[1,32], index: 4, kind: input, shape index: {}]   ;;  %s2000_s5 = inlined_call_operand.hbm [shape: f32[32,32], index: 5, kind: input, shape index: {}]   ;;  %s2001_s6 = inlined_call_operand.vmem [shape: f32[1,32], index: 6, kind: input, shape index: {}]   ;;  %s2002_s7 = inlined_call_operand.hbm [shape: f32[32,32], index: 7, kind: input, shape index: {}]   ;;  %s2003_s8 = inlined_call_operand.vmem [shape: f32[1,32], index: 8, kind: input, shape index: {}]   ;;  %s2004_s9 = inlined_call_operand.hbm [shape: f32[32,32], index: 9, kind: input, shape index: {}]   ;;  %s2005_s10 = inlined_call_operand.vmem [shape: f32[1,32], index: 10, kind: input, shape index: {}]   ;;  %s2006_s11 = inlined_call_operand.hbm [shape: f32[2,8,32], index: 11, kind: output, shape index: {}]  }
   0x1   :  { %2018 = sst [smem:[#allocation25_spill]] %s1996_s1 }
   0x2   :  { %2019 = sst [smem:[#allocation26_spill]] %s1998_s3 }
   0x3   :  { %2020 = sst [smem:[#allocation27_spill]] %s2000_s5 }
   0x4   :  { %2021 = sst [smem:[#allocation28_spill]] %s2002_s7 }
   0x5   :  { %2022 = sst [smem:[#allocation29_spill]] %s2004_s9 }
   0x6   :  { %2023 = sst [smem:[#allocation30_spill]] %s2005_s10 }
   0x7   :  { %16 = vsyncpa [#allocation3], 0 }
   0x8   :  { %18 = vsyncpa [#allocation3 + $0x1], 0 }
   0x9   :  { %19 = vsyncpa [#allocation6], 0 }
   0xa   :  { %21 = vsyncpa [#allocation6 + $0x1], 0 }
   0xb   :  { %22 = vsyncpa [#allocation9], 0 }
   0xc   :  { %23 = vsyncpa [#allocation12], 0 }
   0xd   :  { %24 = vsyncpa [#allocation4], 0 }
   0xe   :  { %26 = vsyncpa [#allocation4 + $0x1], 0  ;;  %s1700_s17 = smov 0   ;;  %s1702_s18 = smov 0  }
   0xf   :  { %s1704_s19 = smov 0   ;;  %s1706_s20 = smov 0  }
  0x10 LB: > { %2024 = sst [smem:[#allocation20_spill]] %s1614_s17  ;;  %s1724_s24 = sadd.s32 4294967295, %s1626_s20   ;;  %s1626_s20 = sphi %s1706_s20, %s2052_s20   ;;  %s1622_s19 = sphi %s1704_s19, %s2056_s19   ;;  %s1618_s18 = sphi %s1702_s18, %s2055_s18   ;;  %s1614_s17 = sphi %s1700_s17, %s2054_s17  }
  0x11   : > { %2025 = sst [smem:[#allocation21_spill]] %s1626_s20  ;;  %p1172_p0 = scmp.ge.s32.totalorder %s1626_s20, 1 }
  0x12   : > { %s2026_s3 = sld [smem:[#allocation26_spill]]  ;;  %p2017_p1 = scmp.eq.s32.totalorder %s1724_s24, 0 }
  0x13   : > { %p309_p2 = scmp.lt.s32.totalorder %s1626_s20, 3  ;;  %s1628_s26 = smov [#allocation8]  }
  0x14   : > { %s322_s27 = sshll.u32 %s1628_s26, 4  ;;  %s2028_s7 = sld [smem:[#allocation28_spill]]  ;;  %s323_s27 = int_to_ptr.vmem [resolvable:$true] %s322_s27 }
  0x15   : > { %p1729_p3 = pnand %p1172_p0, %p309_p2  ;;  %s1629_s13 = smov [#allocation11]  }
  0x16   : > { %s356_s14 = sshll.u32 %s1629_s13, 4  ;;  %s2007_s15 = smov 128   ;;  %s357_s14 = int_to_ptr.vmem [resolvable:$true] %s356_s14 }
  0x17   : > { %p1237_p4 = pneg %p1729_p3  ;;  %s2009_s16 = smov 8  }
  0x18   : > { %s320_s23 = sshll.u32 %s2026_s3, 4  ;;  %s1171_s21 = sadd.s32 4294967294, %s1626_s20   ;;  %s321_s23 = int_to_ptr.hbm [resolvable:$true] %s320_s23 }
  0x19   : > { %p1741_p6 = pnand %p1237_p4, %p2017_p1  ;;  %s1757_s22 = sadd.s32 1, %s1626_s20  }
  0x1a   : > { %s354_s30 = sshll.u32 %s2028_s7, 4  ;;  %2030 = sst [smem:[#allocation22_spill]] %s1757_s22  ;;  %s355_s30 = int_to_ptr.hbm [resolvable:$true] %s354_s30 }
  0x1b   : > { %1240 = dma.hbm_to_vmem [thread:$0]  (!%p1741_p6), %s321_s23, 512, %s323_s27, [#allocation9], %s2007_s15, %s2007_s15, %s2009_s16  }
  0x1c   : > { %1246 = dma.hbm_to_vmem [thread:$0]  (!%p1741_p6), %s355_s30, 512, %s357_s14, [#allocation12], %s2007_s15, %s2007_s15, %s2009_s16  }
  0x1d   : > { %s36_s26 = ssub.s32 %s1626_s20, %s1757_s22  ;;  %s39_s28 = sadd.s32 1, %s1622_s19 }
  0x1e   : > { %p37_p7 = scmp.eq.s32.totalorder %s36_s26, 0  ;;  %p46_p8 = scmp.ne.s32.totalorder %s1622_s19, %s1618_s18 }
  0x1f   : > { %p47_p9 = scmp.eq.s32.totalorder %s1626_s20, 0  ;;  %p52_p10 = scmp.ne.s32.totalorder %s1618_s18, %s1614_s17 }
  0x20   : > { %s1768_s23 = scalar_select %p37_p7, %s1622_s19, %s39_s28  }
  0x21   : > { %p48_p11 = por %p47_p9, %p46_p8  ;;  %p1772_p12 = por %p2017_p1, %p52_p10 }
  0x22   : > { %2031 = sst [smem:[#allocation23_spill]] %s1768_s23  ;;  %p296_p13 = scmp.eq.s32.totalorder %s1724_s24, 1 }
  0x23   : > { %p302_p0 = scmp.eq.s32.totalorder %s1171_s21, 1  ;;  %p1268_p2 = scmp.lt.s32.totalorder %s1626_s20, 2 }
  0x24   : > { %s2013_s29 = sand.u32 1, %s1622_s19   ;;  %p1779_p4 = por %p296_p13, %p46_p8 }
  0x25   : > { %p1783_p5 = por %p302_p0, %p52_p10  ;;  %s1789_s14 = sshll.u32 %s2013_s29, 3 }
  0x26   : > { %s1792_s26 = sshll.u32 %s1626_s20, 3  ;;  %p1794_p7 = pnand %p1268_p2, %p48_p11 }
  0x27   : > { %s2034_s13 = scalar_select %p1783_p5, 1, 0 }
  0x28   : > { %s409_s21 = sand.u32 1, %s1626_s20   ;;  %s2037_s1 = sld [smem:[#allocation25_spill]] }
  0x29   : > { %2035 = sst [smem:[#allocation24_spill]] %s2034_s13  ;;  %s413_s23 = scalar_lea.vmem [#allocation5], %s1789_s14 }
  0x2a   : > { %s421_s22 = sshll.u32 %s413_s23, 4  ;;  %s1804_s29 = scalar_lea.sflag [#allocation6], %s409_s21  ;;  %s422_s22 = int_to_ptr.vmem [resolvable:$true] %s421_s22 }
  0x2b   : > { %p1402_p9 = pneg %p1794_p7 }
  0x2e   : > { %s417_s3 = scalar_lea.hbm %s2037_s1, %s1792_s26 }
  0x2f   : > { %s419_s7 = sshll.u32 %s417_s3, 4  ;;  %s1405_s3 = scalar_lea.hbm %s2037_s1, 16  ;;  %s420_s7 = int_to_ptr.hbm [resolvable:$true] %s419_s7 }
  0x30   : > { %s1398_s13 = sshra.s32 %s420_s7, 4  ;;  %s1399_s13 = int_to_ptr.hbm [resolvable:$true] %s1398_s13 }
  0x31   : > { %s1400_s17 = scalar_lea.hbm %s1399_s13, 8  ;;  %p1406_p13 = scmp.lt.s32.totalorder %s1399_s13, %s2037_s1 }
  0x32   : > { %p1401_p8 = scmp.ne.s32.totalorder %s1399_s13, %s1400_s17  ;;  %p1407_p0 = scmp.lt.s32.totalorder %s1405_s3, %s1400_s17 }
  0x34   : > { %p1403_p10 = pnand %p1402_p9, %p1401_p8  ;;  %p1408_p2 = por %p1407_p0, %p1406_p13 }
  0x36   : > { %p1404_p11 = pneg %p1403_p10 }
  0x38   : > { %p1409_p1 = pnand %p1408_p2, %p1404_p11 }
  0x3a   : > { %1412 = shalt.err (!%p1409_p1)
}
  0x3b   : > { %1256 = dma.hbm_to_vmem [thread:$0]  (!%p1794_p7), %s420_s7, 128, %s422_s22, %s1804_s29  }
  0x3c   : > { %s2038_s5 = sld [smem:[#allocation27_spill]]  ;;  %s1632_s15 = smov [#allocation10]  }
  0x3d   : > { %s339_s13 = sshll.u32 %s1632_s15, 4  ;;  %s2039_s9 = sld [smem:[#allocation29_spill]]  ;;  %s340_s13 = int_to_ptr.vmem [resolvable:$true] %s339_s13 }
  0x3e   : > { %s2040_s23 = smov 8   ;;  %s2041_s1 = smov 128  }
  0x3f   : > { %s1633_s7 = smov [#allocation13]   ;;  %s398_s15 = scalar_lea.hbm %s1995_s0, %s1792_s26 }
  0x40   : > { %s373_s22 = sshll.u32 %s1633_s7, 4  ;;  %s394_s17 = scalar_lea.vmem [#allocation2], %s1789_s14  ;;  %s374_s22 = int_to_ptr.vmem [resolvable:$true] %s373_s22 }
  0x41   : > { %s402_s3 = sshll.u32 %s394_s17, 4  ;;  %s403_s3 = int_to_ptr.vmem [resolvable:$true] %s402_s3 }
  0x42   : > { %s337_s20 = sshll.u32 %s2038_s5, 4  ;;  %s400_s5 = sshll.u32 %s398_s15, 4  ;;  %s338_s20 = int_to_ptr.hbm [resolvable:$true] %s337_s20  ;;  %s401_s5 = int_to_ptr.hbm [resolvable:$true] %s400_s5 }
  0x43   : > { %s371_s16 = sshll.u32 %s2039_s9, 4  ;;  %s1488_s9 = sshra.s32 %s401_s5, 4  ;;  %s372_s16 = int_to_ptr.hbm [resolvable:$true] %s371_s16  ;;  %s1489_s9 = int_to_ptr.hbm [resolvable:$true] %s1488_s9 }
  0x44   : > { %1243 = dma.hbm_to_vmem [thread:$0]  (!%p1741_p6), %s338_s20, 512, %s340_s13, [#allocation9], %s2041_s1, %s2041_s1, %s2040_s23  }
  0x45   : > { %1249 = dma.hbm_to_vmem [thread:$0]  (!%p1741_p6), %s372_s16, 512, %s374_s22, [#allocation12], %s2041_s1, %s2041_s1, %s2040_s23  }
  0x46   : > { %s2042_s20 = sand.u32 1, %s1622_s19   ;;  %s1490_s7 = scalar_lea.hbm %s1489_s9, 8 }
  0x47   : > { %s391_s13 = scalar_lea.sflag [#allocation3], %s2042_s20  ;;  %p1491_p1 = scmp.ne.s32.totalorder %s1489_s9, %s1490_s7 }
  0x48   : > { %s1495_s16 = scalar_lea.hbm %s1995_s0, 16  ;;  %p1496_p6 = scmp.lt.s32.totalorder %s1489_s9, %s1995_s0 }
  0x49   : > { %p1493_p8 = pnand %p1491_p1, %p1402_p9  ;;  %p1497_p11 = scmp.lt.s32.totalorder %s1495_s16, %s1490_s7 }
  0x4b   : > { %p1494_p10 = pneg %p1493_p8  ;;  %p1498_p13 = por %p1497_p11, %p1496_p6 }
  0x4d   : > { %p1499_p0 = pnand %p1498_p13, %p1494_p10 }
  0x4f   : > { %1502 = shalt.err (!%p1499_p0)
}
  0x50   : > { %1253 = dma.hbm_to_vmem [thread:$0]  (!%p1794_p7), %s401_s5, 128, %s403_s3, %s391_s13  }
  0x51   : > { %s436_s15 = scalar_lea.hbm %s1997_s2, %s1792_s26  ;;  %s432_s17 = scalar_lea.vmem [#allocation7], %s1789_s14 }
  0x52   : > { %s440_s20 = sshll.u32 %s432_s17, 4  ;;  %s438_s1 = sshll.u32 %s436_s15, 4  ;;  %s441_s20 = int_to_ptr.vmem [resolvable:$true] %s440_s20  ;;  %s439_s1 = int_to_ptr.hbm [resolvable:$true] %s438_s1 }
  0x53   : > { %s1518_s9 = sshra.s32 %s439_s1, 4  ;;  %s1525_s5 = scalar_lea.hbm %s1997_s2, 16  ;;  %s1519_s9 = int_to_ptr.hbm [resolvable:$true] %s1518_s9 }
  0x54   : > { %s1520_s7 = scalar_lea.hbm %s1519_s9, 8  ;;  %p1526_p10 = scmp.lt.s32.totalorder %s1519_s9, %s1997_s2 }
  0x55   : > { %p1521_p2 = scmp.ne.s32.totalorder %s1519_s9, %s1520_s7  ;;  %p1527_p6 = scmp.lt.s32.totalorder %s1525_s5, %s1520_s7 }
  0x57   : > { %p1523_p1 = pnand %p1521_p2, %p1402_p9  ;;  %p1528_p11 = por %p1527_p6, %p1526_p10 }
  0x59   : > { %p1524_p8 = pneg %p1523_p1 }
  0x5b   : > { %p1529_p13 = pnand %p1528_p11, %p1524_p8 }
  0x5d   : > { %1532 = shalt.err (!%p1529_p13)
}
  0x5e   : > { %1259 = dma.hbm_to_vmem [thread:$0]  (!%p1794_p7), %s439_s1, 128, %s441_s20, %s1804_s29  }
  0x5f   : > { %449 = sbr.rel (%p1729_p3) target bundleno = 1154 (0x482), region = 64  ;;  %s1874_s14 = sand.u32 (!%p1729_p3), 1, %s1618_s18  }
  0x60   : > { %s1877_s26 = sshll.u32 (!%p1729_p3), %s1874_s14, 3  ;;  %s452_s23 = scalar_lea.sflag (!%p1729_p3), [#allocation3], %s1874_s14 }
  0x61   : > { %s455_s22 = scalar_lea.vmem (!%p1729_p3), [#allocation2], %s1877_s26 }
  0x64   : > { %1593 = dma.done.wait (%p1772_p12), %s452_s23, 128  }
  0x65   : > { %1595 = vsyncadd (%p1772_p12), %s452_s23, 4294967168  ;;  %s461_s25 = sand.u32 1, %s1724_s24   ;;  %s465_s28 = scalar_lea.vmem [#allocation5], %s1877_s26 }
  0x66   : > { %s462_s29 = scalar_lea.sflag [#allocation6], %s461_s25 }
  0x67   : > { %1597 = dma.done.wait (%p1772_p12), %s462_s29, 256  }
  0x68   : > { %1599 = vsyncadd (%p1772_p12), %s462_s29, 4294967040  ;;  %s475_s10 = scalar_lea.vmem [#allocation7], %s1877_s26  ;;  %p2043_p3 = scmp.eq.s32.totalorder %s1724_s24, 0 }
  0x6a   : > { %1601 = dma.done.wait (%p2043_p3), [#allocation9], 1024   ;;  %p2044_p7 = pmov %p2043_p3 }
  0x6b   : > { %p2045_p9 = pmov %p2043_p3 }
  0x6c   : > { %1603 = vsyncadd (%p2044_p7), [#allocation9], 4294966272 }
  0x6d   : > { %1605 = dma.done.wait (%p2045_p9), [#allocation12], 1024   ;;  %p2046_p0 = pmov %p2043_p3 }
  0x6e   : > { %v583_v0 = vld [vmem:[#allocation10 + $0x18] sm:$0xff]  ;;  %v582_v1 = vld [vmem:[#allocation10 + $0x10] sm:$0xff]  ;;  %v581_v4 = vld [vmem:[#allocation10 + $0x8] sm:$0xff]  ;;  %vm556_vm0 = vcmask 261120   ;;  %vm642_vm1 = vcmask 64512   ;;  %s1634_s20 = smov 104  }
  0x6f   : > { %1607 = vsyncadd (%p2046_p0), [#allocation12], 4294966272  ;;  %v551_v2 = vld [vmem:[#allocation8 + $0x18] sm:$0xff]  ;;  %603 = vmatpush.msra.mxu1 %v583_v0  ;;  %v550_v3 = vld [vmem:[#allocation8 + $0x10] sm:$0xff]  ;;  %s1635_s1 = smov 120   ;;  %s1636_s9 = smov 112  }
  0x70   : > { %572 = vmatpush.msra.mxu0 %v551_v2  ;;  %v549_v5 = vld [vmem:[#allocation8 + $0x8] sm:$0xff]  ;;  %v580_v6 = vld [vmem:[#allocation10] sm:$0xff]  ;;  %v545_v9 = vld [vmem:[%s455_s22] sm:$0xff]  ;;  %s1637_s16 = smov 8   ;;  %s1638_s5 = smov 16  }
  0x71   : > { %604 = vmatpush.msra.mxu1 %v582_v1  ;;  %v548_v7 = vld [vmem:[#allocation8] sm:$0xff]  ;;  %v1318_v10 = vld [vmem:[%s2001_s6] ss:$0 sm:$0xff]  ;;  %v614_v16 = vld [vmem:[#allocation11 + $0x18] sm:$0xff]  ;;  %s1639_s3 = smov 24   ;;  %s1210_s13 = sshll.u32 %s1724_s24, 3 }
  0x72   : > { %573 = vmatpush.msra.mxu0 %v550_v3  ;;  %v546_v8 = vld [vmem:[%s465_s28] sm:$0xff]  ;;  %v1319_v11 = vld [vmem:[%s1999_s4] ss:$0 sm:$0xff]  ;;  %634 = vmatpush.msra.mxu2 %v614_v16  ;;  %s1015_s25 = scalar_lea.hbm %s2006_s11, %s1210_s13  ;;  %s544_s27 = scalar_lea.vmem [#allocation14], %s1877_s26 }
  0x73   : > { %605 = vmatpush.msra.mxu1 %v581_v4  ;;  %v613_v17 = vld [vmem:[#allocation11 + $0x10] sm:$0xff]  ;;  %v612_v18 = vld [vmem:[#allocation11 + $0x8] sm:$0xff]  ;;  %v611_v19 = vld [vmem:[#allocation11] sm:$0xff]  ;;  %s1017_s21 = sshll.u32 %s544_s27, 4  ;;  %s1019_s15 = sshll.u32 %s1015_s25, 4  ;;  %s1018_s21 = int_to_ptr.vmem [resolvable:$true] %s1017_s21  ;;  %s1020_s15 = int_to_ptr.hbm [resolvable:$true] %s1019_s15 }
  0x74   : > { %574 = vmatpush.msra.mxu0 %v549_v5  ;;  %635 = vmatpush.msra.mxu2 %v613_v17  ;;  %v547_v20 = vld [vmem:[%s475_s10] sm:$0xff]  ;;  %s2047_s10 = sld [smem:[#allocation30_spill]]  ;;  %s1005_s17 = scalar_lea.sflag [#allocation4], %s1874_s14 }
  0x75   : > { %606 = vmatpush.msra.mxu1 %v580_v6  ;;  %v1320_v30 = vld [vmem:[%s2003_s8] ss:$0 sm:$0xff]  ;;  %s1562_s24 = sshra.s32 %s1020_s15, 4  ;;  %s1568_s26 = scalar_lea.hbm %s2006_s11, 16  ;;  %s1563_s24 = int_to_ptr.hbm [resolvable:$true] %s1562_s24 }
  0x76   : > { %575 = vmatpush.msra.mxu0 %v548_v7  ;;  %1194 = vmatmul.msk.f32.vlgmr.msra.gmra.mxu1 %vm556_vm0, %v546_v8  ;;  %p1569_p8 = scmp.lt.s32.totalorder %s1563_s24, %s2006_s11 }
  0x77   : > { %1193 = vmatmul.msk.f32.vlgmr.msra.gmra.mxu0 %vm556_vm0, %v545_v9  ;;  %636 = vmatpush.msra.mxu2 %v612_v18 }
  0x79   : > { %637 = vmatpush.msra.mxu2 %v611_v19 }
  0x7a   : > { %1195 = vmatmul.msk.f32.vlgmr.msra.gmra.mxu2 %vm556_vm0, %v547_v20 }
  0xf3   : > { %v608_v12 = vpop.f32.mrf.mxu1 }
  0xf4   : > { %v577_v13 = vpop.f32.mrf.mxu0  ;;  %v609_v14 = vadd.f32 %v1318_v10, %v608_v12 }
  0xf5   : > { %v578_v15 = vadd.f32 %v1319_v11, %v577_v13 }
  0xf6   : > { %878 = vrot.lane.b32.xlu2 %v609_v14, %s1634_s20  ;;  %719 = vrot.lane.b32.xlu1 %v609_v14, %s1635_s1 }
  0xf7   : > { %799 = vrot.lane.b32.xlu0 %v609_v14, %s1636_s9  ;;  %1196 = vmatpush.xpose.msk.msra.mxu3 %vm642_vm1, %v609_v14 }
  0xfa   : > { %1197 = vmatmul.msk.f32.vlgmr.msra.gmra.mxu3 %vm642_vm1, %v578_v15 }
  0xfd   : > { %v639_v31 = vpop.f32.mrf.mxu2 }
  0xfe   : > { %876 = vrot.lane.b32.xlu2 %v578_v15, %s1634_s20  ;;  %717 = vrot.lane.b32.xlu1 %v578_v15, %s1635_s1  ;;  %v640_v32 = vadd.f32 %v1320_v30, %v639_v31 }
  0xff   : > { %797 = vrot.lane.b32.xlu0 %v578_v15, %s1636_s9 }
 0x100   : > { %712 = vmatpush.msrb.mxu3 %v640_v32 }
 0x150   : > { %v879_v22 = vpop.permute.xlu2 %878 }
 0x158   : > { %v877_v26 = vpop.permute.xlu2 %876 }
 0x168   : > { %v720_v21 = vpop.permute.xlu1 %719 }
 0x169   : > { %v800_v23 = vpop.permute.xlu0 %799  ;;  %1199 = vmatpush.xpose.msk.msrb.mxu0 %vm642_vm1, %v720_v21 }
 0x16a   : > { %1202 = vmatpush.xpose.msk.msrb.mxu2 %vm642_vm1, %v800_v23 }
 0x16d   : > { %1205 = vmatpush.xpose.msk.msra.mxu0 %vm642_vm1, %v879_v22 }
 0x170   : > { %v718_v24 = vpop.permute.xlu1 %717 }
 0x171   : > { %v798_v25 = vpop.permute.xlu0 %797  ;;  %1200 = vmatmul.msk.f32.vlgmr.msrb.gmra.mxu0 %vm642_vm1, %v718_v24 }
 0x172   : > { %1203 = vmatmul.msk.f32.vlgmr.msrb.gmra.mxu2 %vm642_vm1, %v798_v25 }
 0x179   : > { %1206 = vmatmul.msk.f32.vlgmr.msra.gmra.mxu0 %vm642_vm1, %v877_v26 }
 0x17d   : > { %v666_v27 = vpop.f32.mrf.mxu3 }
 0x17e   : > { %v669_v28 = vmul.f32 0.35355338, %v666_v27 }
 0x180   : > { %v670_v29 = vsel %vm642_vm1, %v669_v28, -inf }
 0x181   : > { %671 = vmax.xlane.f32.xlu0 %v670_v29 }
 0x1ee   : > { %v742_v33 = vpop.f32.mrf.mxu0 }
 0x1ef   : > { %v745_v34 = vmul.f32 0.35355338, %v742_v33 }
 0x1f1   : > { %v746_v35 = vsel %vm642_vm1, %v745_v34, -inf }
 0x1f2   : > { %747 = vmax.xlane.f32.xlu1 %v746_v35 }
 0x1f4   : > { %v672_v36 = vpop.xlane.xlu0 %671 }
 0x1f5   : > { %v673_v37 = vsub.f32 %v669_v28, %v672_v36  ;;  %v822_v38 = vpop.f32.mrf.mxu2 }
 0x1f6   : > { %v825_v39 = vmul.f32 0.35355338, %v822_v38  ;;  %v901_v42 = vpop.f32.mrf.mxu0 }
 0x1f7   : > { %v674_v40 = vmul.f32 1.442695, %v673_v37  ;;  %v904_v43 = vmul.f32 0.35355338, %v901_v42 }
 0x1f8   : > { %v826_v41 = vsel %vm642_vm1, %v825_v39, -inf }
 0x1f9   : > { %1322 = vpow2.f32 %v674_v40  ;;  %827 = vmax.xlane.f32.xlu2 %v826_v41  ;;  %v905_v45 = vsel %vm642_vm1, %v904_v43, -inf }
 0x1ff   : > { %v1323_v44 = vpop.eup %1322 }
 0x200   : > { %v676_v46 = vsel %vm642_vm1, %v1323_v44, 0.0 }
 0x201   : > { %906 = vmax.xlane.f32.xlu2 %v905_v45  ;;  %677 = vadd.xlane.f32.xlu0 %v676_v46 }
 0x265   : > { %v748_v47 = vpop.xlane.xlu1 %747 }
 0x266   : > { %v749_v48 = vsub.f32 %v745_v34, %v748_v47 }
 0x268   : > { %v750_v49 = vmul.f32 1.442695, %v749_v48 }
 0x26a   : > { %1324 = vpow2.f32 %v750_v49 }
 0x26c   : > { %v828_v50 = vpop.xlane.xlu2 %827 }
 0x26d   : > { %v829_v51 = vsub.f32 %v825_v39, %v828_v50 }
 0x26f   : > { %v830_v52 = vmul.f32 1.442695, %v829_v51 }
 0x270   : > { %v1933_v53 = vpop.eup %1324 }
 0x271   : > { %1326 = vpow2.f32 %v830_v52  ;;  %v752_v54 = vsel %vm642_vm1, %v1933_v53, 0.0 }
 0x272   : > { %753 = vadd.xlane.f32.xlu1 %v752_v54  ;;  %v974_v54 = vld [vmem:[#allocation13 + $0x10] sm:$0xff] }
 0x274   : > { %v907_v55 = vpop.xlane.xlu2 %906  ;;  %v678_v56 = vpop.xlane.xlu0 %677 }
 0x275   : > { %v908_v57 = vsub.f32 %v904_v43, %v907_v55  ;;  %1328 = vrcp.f32 %v678_v56  ;;  %v690_v1 = vand.u32 2147483648, %v678_v56  ;;  %v688_v3 = vand.u32 2147483647, %v678_v56  ;;  %v973_v55 = vld [vmem:[#allocation13 + $0x8] sm:$0xff] }
 0x276   : > { %vm684_vm3 = vweird.f32 %v678_v56 }
 0x277   : > { %v1937_v58 = vpop.eup %1326  ;;  %v909_v59 = vmul.f32 1.442695, %v908_v57  ;;  %v691_v6 = vor.u32 1.1754944e-38, %v690_v1  ;;  %vm689_vm5 = vcmp.eq.f32.partialorder %v688_v3, 8.507059e+37 }
 0x278   : > { %v832_v60 = vsel %vm642_vm1, %v1937_v58, 0.0 }
 0x279   : > { %1330 = vpow2.f32 %v909_v59  ;;  %833 = vadd.xlane.f32.xlu2 %v832_v60 }
 0x27b   : > { %v1329_v61 = vpop.eup %1328 }
 0x27c   : > { %v680_v62 = vmul.f32 %v1329_v61, %v678_v56  ;;  %vm685_vm2 = vweird.f32 %v1329_v61  ;;  %v972_v56 = vld [vmem:[#allocation13] sm:$0xff] }
 0x27d   : > { %vm686_vm4 = vmor %vm684_vm3, %vm685_vm2 }
 0x27e   : > { %v681_v63 = vsub.f32 1.0, %v680_v62 }
 0x27f   : > { %v1941_v0 = vpop.eup %1330 }
 0x280   : > { %v682_v2 = vmul.f32 %v1329_v61, %v681_v63  ;;  %v911_v4 = vsel %vm642_vm1, %v1941_v0, 0.0  ;;  %v1321_v63 = vld [vmem:[%s2047_s10] ss:$0 sm:$0xff] }
 0x281   : > { %912 = vadd.xlane.f32.xlu0 %v911_v4 }
 0x282   : > { %v683_v5 = vadd.f32 %v1329_v61, %v682_v2 }
 0x284   : > { %v687_v7 = vsel %vm686_vm4, %v1329_v61, %v683_v5  ;;  %vm968_vm4 = vcmask 130048  }
 0x285   : > { %v692_v8 = vsel %vm689_vm5, %v691_v6, %v687_v7  ;;  %vm970_vm5 = vcmask 195584  }
 0x286   : > { %v693_v9 = vmul.f32 %v1323_v44, %v692_v8 }
 0x288   : > { %1198 = vmatmul.msk.f32.vlgmr.msrb.gmra.mxu3 %vm642_vm1, %v693_v9 }
 0x28b   : > { %771 = vrot.lane.b32.xlu1 %v640_v32, %s1635_s1 }
 0x291   : > { %850 = vrot.lane.b32.xlu2 %v640_v32, %s1636_s9 }
 0x295   : > { %929 = vrot.lane.b32.xlu0 %v640_v32, %s1634_s20  ;;  %s1564_s20 = scalar_lea.hbm %s1563_s24, 8 }
 0x296   : > { %p1565_p12 = scmp.ne.s32.totalorder %s1563_s24, %s1564_s20  ;;  %p1570_p10 = scmp.lt.s32.totalorder %s1568_s26, %s1564_s20 }
 0x298   : > { %p1566_p2 = pnand %p1565_p12, %p1779_p4  ;;  %p1571_p6 = por %p1570_p10, %p1569_p8 }
 0x29a   : > { %p1567_p1 = pneg %p1566_p2 }
 0x29c   : > { %p1572_p11 = pnand %p1571_p6, %p1567_p1 }
 0x2e5   : > { %v754_v10 = vpop.xlane.xlu1 %753 }
 0x2e6   : > { %1332 = vrcp.f32 %v754_v10  ;;  %v766_v18 = vand.u32 2147483648, %v754_v10  ;;  %vm760_vm7 = vweird.f32 %v754_v10  ;;  %v764_v22 = vand.u32 2147483647, %v754_v10 }
 0x2e8   : > { %v767_v26 = vor.u32 1.1754944e-38, %v766_v18  ;;  %vm765_vm10 = vcmp.eq.f32.partialorder %v764_v22, 8.507059e+37 }
 0x2ec   : > { %v1333_v11 = vpop.eup %1332  ;;  %v834_v12 = vpop.xlane.xlu2 %833 }
 0x2ed   : > { %v756_v13 = vmul.f32 %v1333_v11, %v754_v10  ;;  %1334 = vrcp.f32 %v834_v12  ;;  %vm761_vm6 = vweird.f32 %v1333_v11  ;;  %v846_v24 = vand.u32 2147483648, %v834_v12 }
 0x2ee   : > { %vm762_vm8 = vmor %vm760_vm7, %vm761_vm6  ;;  %v844_v28 = vand.u32 2147483647, %v834_v12  ;;  %vm840_vm11 = vweird.f32 %v834_v12 }
 0x2ef   : > { %v757_v14 = vsub.f32 1.0, %v756_v13  ;;  %v847_v32 = vor.u32 1.1754944e-38, %v846_v24 }
 0x2f0   : > { %vm845_vm13 = vcmp.eq.f32.partialorder %v844_v28, 8.507059e+37 }
 0x2f1   : > { %v758_v15 = vmul.f32 %v1333_v11, %v757_v14 }
 0x2f3   : > { %v1335_v16 = vpop.eup %1334  ;;  %v759_v17 = vadd.f32 %v1333_v11, %v758_v15 }
 0x2f4   : > { %v836_v19 = vmul.f32 %v1335_v16, %v834_v12  ;;  %v851_v20 = vpop.permute.xlu2 %850  ;;  %v913_v21 = vpop.xlane.xlu0 %912  ;;  %vm841_vm9 = vweird.f32 %v1335_v16 }
 0x2f5   : > { %1336 = vrcp.f32 %v913_v21  ;;  %871 = vmatpush.msra.mxu3 %v851_v20  ;;  %v763_v25 = vsel %vm762_vm8, %v1333_v11, %v759_v17  ;;  %vm842_vm12 = vmor %vm840_vm11, %vm841_vm9  ;;  %v925_v40 = vand.u32 2147483648, %v913_v21  ;;  %v923_v42 = vand.u32 2147483647, %v913_v21 }
 0x2f6   : > { %v837_v23 = vsub.f32 1.0, %v836_v19  ;;  %v768_v30 = vsel %vm765_vm10, %v767_v26, %v763_v25  ;;  %vm919_vm15 = vweird.f32 %v913_v21 }
 0x2f7   : > { %v769_v37 = vmul.f32 %v1933_v53, %v768_v30  ;;  %v926_v44 = vor.u32 1.1754944e-38, %v925_v40  ;;  %vm924_vm3 = vcmp.eq.f32.partialorder %v923_v42, 8.507059e+37  ;;  %v975_v53 = vld [vmem:[#allocation13 + $0x18] sm:$0xff] }
 0x2f8   : > { %v838_v27 = vmul.f32 %v1335_v16, %v837_v23  ;;  %995 = vmatpush.msra.mxu2 %v975_v53 }
 0x2fa   : > { %v839_v29 = vadd.f32 %v1335_v16, %v838_v27  ;;  %996 = vmatpush.msra.mxu2 %v974_v54 }
 0x2fb   : > { %v1337_v31 = vpop.eup %1336 }
 0x2fc   : > { %v843_v33 = vsel %vm842_vm12, %v1335_v16, %v839_v29  ;;  %v915_v34 = vmul.f32 %v1337_v31, %v913_v21  ;;  %vm920_vm14 = vweird.f32 %v1337_v31  ;;  %997 = vmatpush.msra.mxu2 %v973_v55 }
 0x2fd   : > { %v848_v35 = vsel %vm845_vm13, %v847_v32, %v843_v33  ;;  %v772_v36 = vpop.permute.xlu1 %771  ;;  %vm921_vm2 = vmor %vm919_vm15, %vm920_vm14 }
 0x2fe   : > { %v916_v38 = vsub.f32 1.0, %v915_v34  ;;  %792 = vmatpush.msrb.mxu1 %v772_v36  ;;  %v849_v39 = vmul.f32 %v1937_v58, %v848_v35  ;;  %998 = vmatpush.msra.mxu2 %v972_v56 }
 0x2ff   : > { %1201 = vmatmul.msk.f32.vlgmr.msrb.gmra.mxu1 %vm642_vm1, %v769_v37 }
 0x300   : > { %v917_v41 = vmul.f32 %v1337_v31, %v916_v38  ;;  %1204 = vmatmul.msk.f32.vlgmr.msra.gmra.mxu3 %vm642_vm1, %v849_v39 }
 0x302   : > { %v918_v43 = vadd.f32 %v1337_v31, %v917_v41 }
 0x304   : > { %v922_v45 = vsel %vm921_vm2, %v1337_v31, %v918_v43 }
 0x305   : > { %v927_v46 = vsel %vm924_vm3, %v926_v44, %v922_v45 }
 0x306   : > { %v928_v47 = vmul.f32 %v1941_v0, %v927_v46 }
 0x307   : > { %v930_v48 = vpop.permute.xlu0 %929 }
 0x308   : > { %950 = vmatpush.msra.mxu1 %v930_v48 }
 0x309   : > { %1207 = vmatmul.msk.f32.vlgmr.msra.gmra.mxu1 %vm642_vm1, %v928_v47 }
 0x30b   : > { %v714_v49 = vpop.f32.mrf.mxu3 }
 0x37c   : > { %v794_v50 = vpop.f32.mrf.mxu1 }
 0x37d   : > { %956 = vrot.lane.b32.xlu1 %v794_v50, %s1637_s16 }
 0x383   : > { %v873_v51 = vpop.f32.mrf.mxu3 }
 0x384   : > { %960 = vrot.lane.b32.xlu0 %v873_v51, %s1638_s5 }
 0x386   : > { %v952_v52 = vpop.f32.mrf.mxu1 }
 0x387   : > { %964 = vrot.lane.b32.xlu2 %v952_v52, %s1639_s3 }
 0x3e1   : > { %v965_v60 = vpop.permute.xlu2 %964 }
 0x3ef   : > { %v957_v57 = vpop.permute.xlu1 %956 }
 0x3f0   : > { %v967_v58 = vsel %vm642_vm1, %v714_v49, %v957_v57 }
 0x3f6   : > { %v961_v59 = vpop.permute.xlu0 %960 }
 0x3f7   : > { %v969_v61 = vsel %vm968_vm4, %v967_v58, %v961_v59 }
 0x3f8   : > { %v971_v62 = vsel %vm970_vm5, %v969_v61, %v965_v60 }
 0x3f9   : > { %1208 = vmatmul.msk.f32.vlgmr.msra.gmra.mxu2 %vm556_vm0, %v971_v62 }
 0x47c   : > { %v1000_v0 = vpop.f32.mrf.mxu2 }
 0x47d   : > { %v1001_v1 = vadd.f32 %v1321_v63, %v1000_v0 }
 0x47f   : > { %1003 = vst.msk [vmem:[%s544_s27] sm:$0xff] %vm556_vm0, %v1001_v1 }
 0x480   : > { %1575 = shalt.err (!%p1572_p11)
}
 0x481   : > { %1235 = dma.vmem_to_hbm [thread:$0]  (%p1779_p4), %s1018_s21, 128, %s1020_s15, %s1005_s17  }
 0x482 PF: > { %s2048_s14 = sld [smem:[#allocation20_spill]] }
 0x483   : > { %s2050_s5 = sld [smem:[#allocation21_spill]] }
 0x488   : > { %s1031_s3 = sand.u32 1, %s2048_s14  }
 0x489   : > { %p2051_p13 = scmp.ge.s32.totalorder %s2050_s5, 2  ;;  %s1032_s13 = scalar_lea.sflag [#allocation4], %s1031_s3 }
 0x48b   : > { %p1261_p3 = pnand %p2051_p13, %p1783_p5 }
 0x48d   : > { %p1262_p7 = pneg %p1261_p3 }
 0x48f   : > { %1609 = dma.done.wait (%p1262_p7), %s1032_s13, 128  }
 0x490   : > { %1611 = vsyncadd (%p1262_p7), %s1032_s13, 4294967168  ;;  %s2052_s20 = sld [smem:[#allocation22_spill]]  ;;  %s2054_s17 = smov %s1618_s18 }
 0x491   : > { %s2053_s23 = sld [smem:[#allocation23_spill]]  ;;  %s2055_s18 = smov %s1622_s19 }
 0x496   : > { %p29_p9 = scmp.ge.s32.totalorder %s2052_s20, 4  }
 0x497   : > { %s2056_s19 = smov %s2053_s23 }
 0x498   :  { %31 = sbr.rel (!%p29_p9) target bundleno = 16 (0x10), region = 149 }
 0x49d   :  { %1038 = vsyncpa [#allocation3], 1 }
 0x49e   :  { %1040 = vsyncpa [#allocation3 + $0x1], 1 }
 0x49f   :  { %1041 = vsyncpa [#allocation6], 1 }
 0x4a0   :  { %1043 = vsyncpa [#allocation6 + $0x1], 1 }
 0x4a1   :  { %1044 = vsyncpa [#allocation9], 1 }
 0x4a2   :  { %1045 = vsyncpa [#allocation12], 1 }
 0x4a3   :  { %1046 = vsyncpa [#allocation4], 1 }
 0x4a4   :  { %1048 = vsyncpa [#allocation4 + $0x1], 1 }

</bundles_post_ra>
